<compile_context>
chip_gen: v5e
topology: v5e:2x2
jax: 0.10.0
libtpu: 0.0.40
codegen_flags: <defaults>
</compile_context>

<pallas_src>
import jax
import jax.numpy as jnp
import numpy as np
from jax.experimental import pallas as pl
from jax.experimental.pallas import tpu as pltpu


# --------------------------------------------------------------------------------------
# Kernel
# --------------------------------------------------------------------------------------
def _make_kernel(Nb, Lp, L_valid, C, K, di, ds):
    """Builds the fused Mamba-branch kernel for one (Nb, Lp, C) block of whole sequences."""
    M = Nb * Lp
    inv_L = 1.0 / float(L_valid)

    def kernel(x_ref, w_in_x_ref, w_in_z_ref, conv_w_ref, conv_b_ref,
               w_b_ref, w_c_ref, a_ref, a_t_ref, d_ref, w_out_ref,
               ln_w_ref, ln_b_ref, o_ref):
        # Lp % 8 == 0, so this (and every reshape below) is a free leading-dim merge/split.
        x = x_ref[...].reshape(M, C)                   # [M, C] f32 (residual kept in f32)
        xb = x.astype(jnp.bfloat16)

        # ---- in_proj: two separate matmuls (no mid-vreg lane slice of a fused output).
        x_p = jnp.dot(xb, w_in_x_ref[...], preferred_element_type=jnp.float32)   # [M, di]
        z = jnp.dot(xb, w_in_z_ref[...], preferred_element_type=jnp.float32)     # [M, di]

        # ---- causal depthwise conv1d (kernel K, left-pad K-1, truncated to L).
        # Rows of a block are whole, contiguous, in-order sequences, so a roll along the
        # flattened row axis keeps every valid row (pos >= shift) inside its own sequence;
        # the iota mask zeroes the first `shift` positions of each sequence.
        pos3 = jax.lax.broadcasted_iota(jnp.int32, (Nb, Lp, 1), 1)   # position in sequence
        cw = conv_w_ref[...]                                          # [K, di] f32
        acc = x_p * cw[K - 1:K, :]                                    # shift == 0 tap
        for k in range(K - 1):
            shift = K - 1 - k
            tap = pltpu.roll(x_p, shift, axis=0) * cw[k:k + 1, :]     # XLU sublane rotate
            tap = jnp.where(pos3 >= shift, tap.reshape(Nb, Lp, di), 0.0).reshape(M, di)
            acc = acc + tap
        x_conv = acc + conv_b_ref[...]
        x_conv = x_conv * jax.nn.sigmoid(x_conv)                      # SiLU, [M, di] f32
        # TODO(synk): dt = softplus(dt_proj(x_conv)) exists in the PyTorch module but is
        # never consumed by SimplifiedMamba.selective_scan (dead code), so it is omitted.

        xcb = x_conv.astype(jnp.bfloat16)

        # ---- simplified selective scan (B/C projections as separate matmuls).
        b_proj = jnp.dot(xcb, w_b_ref[...], preferred_element_type=jnp.float32)  # [M, ds]
        c_proj = jnp.dot(xcb, w_c_ref[...], preferred_element_type=jnp.float32)  # [M, ds]

        x_conv3 = x_conv.reshape(Nb, Lp, di)
        if Lp != L_valid:
            # Padded time steps must not contribute to the per-sequence temporal mean.
            gt = jnp.sum(jnp.where(pos3 < L_valid, x_conv3, 0.0), axis=1) * inv_L
        else:
            gt = jnp.mean(x_conv3, axis=1)                            # [Nb, di]
        gs = jnp.dot(gt.astype(jnp.bfloat16), a_ref[...],
                     preferred_element_type=jnp.float32)              # [Nb, ds]
        sm = ((gs[:, None, :] * b_proj.reshape(Nb, Lp, ds))
              * c_proj.reshape(Nb, Lp, ds)).reshape(M, ds)
        ss = jnp.dot(sm.astype(jnp.bfloat16), a_t_ref[...],
                     preferred_element_type=jnp.float32)              # [M, di]
        ss = ss + x_conv * d_ref[...]

        # ---- gate with SiLU(z), out_proj, residual + LayerNorm over channels.
        y = ss * (z * jax.nn.sigmoid(z))
        y_out = jnp.dot(y.astype(jnp.bfloat16), w_out_ref[...],
                        preferred_element_type=jnp.float32)           # [M, C]
        h = y_out + x
        mu = jnp.mean(h, axis=-1, keepdims=True)
        var = jnp.mean((h - mu) ** 2, axis=-1, keepdims=True)
        h_n = (h - mu) * jax.lax.rsqrt(var + 1e-5)
        o_ref[...] = (h_n * ln_w_ref[...] + ln_b_ref[...]).reshape(Nb, Lp, C)

    return kernel


# --------------------------------------------------------------------------------------
# Tiling / sizing helpers
# --------------------------------------------------------------------------------------
def _cdiv(a, b):
    return -(-a // b)


def _pad_to_multiple(n, m):
    return _cdiv(n, m) * m


def _tpu_generation_defaults():
    kind = ""
    try:
        kind = jax.devices()[0].device_kind.lower()
    except Exception:
        pass
    big_vmem_single_tc = any(t in kind for t in ("v5 lite", "v5e", "v5lite", "v6"))
    if big_vmem_single_tc:
        # v5e / v6e: 128 MiB physical VMEM, one TensorCore -> a single big grid step is fine.
        return dict(vmem_cap=100 * 2**20, dual_tc=False, rows_cap=8192)
    # v7x (64 MiB VMEM, 2 TensorCores) and unknown chips: conservative limit, even grids.
    return dict(vmem_cap=48 * 2**20, dual_tc=True, rows_cap=4096)


def _padded_row_bytes(C, di, ds):
    """Per-row VMEM estimate using lane-padded (last dim -> 128) f32 temp sizes."""
    lane = lambda n: _cdiv(n, 128) * 128
    # Live f32 temps per block row: x / h / output chain, x_p, z, conv acc + tap, x_conv,
    # ss, y, plus the d_state-sized b/c/sm tensors.
    act = 3 * lane(C) + 7 * lane(di) + 4 * lane(ds)
    io = 4 * lane(C)                    # double-buffered input + output block rows
    return 4 * (act + io)


def _choose_tiling(N, Lp, row_bytes, vmem_cap, rows_cap, dual_tc):
    """Pick sequences-per-step (Nb) and a padded N so blocks divide evenly."""
    budget_rows = max(Lp, int(0.7 * vmem_cap) // max(row_bytes, 1))
    max_rows = min(rows_cap, budget_rows)
    nb_cap = max(1, max_rows // Lp)
    steps = max(1, _cdiv(N, nb_cap))
    if dual_tc and N >= 2:
        steps = max(2, steps)
        if steps % 2:
            steps += 1                   # even grid count -> balanced dual-TC work
    nb = _cdiv(N, steps)
    return nb, steps * nb


# --------------------------------------------------------------------------------------
# Parameters (matches the PyTorch module's parameterization)
# --------------------------------------------------------------------------------------
def init_params(key, dim, d_state=16, d_conv=4, expand=2):
    di = int(expand * dim)
    ks = jax.random.split(key, 5)
    s_in = 1.0 / np.sqrt(dim)
    s_di = 1.0 / np.sqrt(di)
    s_cv = 1.0 / np.sqrt(d_conv)
    return {
        # Linear(d_model, 2*d_inner, bias=False)
        "w_in": jax.random.uniform(ks[0], (2 * di, dim), jnp.float32, -s_in, s_in),
        # depthwise Conv1d weight stored as [K, d_inner], plus bias
        "conv_w": jax.random.uniform(ks[1], (d_conv, di), jnp.float32, -s_cv, s_cv),
        "conv_b": jax.random.uniform(ks[2], (1, di), jnp.float32, -s_cv, s_cv),
        # x_proj: Linear(d_inner, 2*d_state, bias=False)
        "w_xp": jax.random.uniform(ks[3], (2 * d_state, di), jnp.float32, -s_di, s_di),
        # A = -exp(A_log), A_log = log([1..d_state]) broadcast over d_inner rows
        "A": -jnp.tile(jnp.arange(1, d_state + 1, dtype=jnp.float32)[None, :], (di, 1)),
        "Dp": jnp.ones((1, di), jnp.float32),
        # out_proj: Linear(d_inner, d_model, bias=False)
        "w_out": jax.random.uniform(ks[4], (dim, di), jnp.float32, -s_di, s_di),
        # LayerNorm(dim): default init weight=1, bias=0
        "ln_w": jnp.ones((1, dim), jnp.float32),
        "ln_b": jnp.zeros((1, dim), jnp.float32),
    }


# --------------------------------------------------------------------------------------
# Wrapper
# --------------------------------------------------------------------------------------
def mamba_branch_forward(x, p):
    B, T, J, C = x.shape
    N = B * J
    di = p["Dp"].shape[-1]
    ds = p["A"].shape[-1]
    K = p["conv_w"].shape[0]

    cfg = _tpu_generation_defaults()
    Lp = _pad_to_multiple(T, 8)          # keep [M,.] <-> [Nb,Lp,.] reshapes free (f32 sublanes)
    row_bytes = _padded_row_bytes(C, di, ds)
    Nb, N_pad = _choose_tiling(N, Lp, row_bytes, cfg["vmem_cap"], cfg["rows_cap"],
                               cfg["dual_tc"])

    # Same row-major memory reinterpretation as the PyTorch `.view(B*J, T, C)`.
    x_r = x.reshape(N, T, C).astype(jnp.float32)
    if (N_pad, Lp) != (N, T):
        x_r = jnp.pad(x_r, ((0, N_pad - N), (0, Lp - T), (0, 0)))

    # Pre-transposed / pre-split bf16 matmul weights (MXU-native operands, f32 accumulation).
    w_in_x = p["w_in"][:di].T.astype(jnp.bfloat16)       # [C, di]
    w_in_z = p["w_in"][di:].T.astype(jnp.bfloat16)       # [C, di]
    w_b = p["w_xp"][:ds].T.astype(jnp.bfloat16)          # [di, ds]
    w_c = p["w_xp"][ds:].T.astype(jnp.bfloat16)          # [di, ds]
    a = p["A"].astype(jnp.bfloat16)                      # [di, ds] (integer-valued -> exact)
    a_t = p["A"].T.astype(jnp.bfloat16)                  # [ds, di]
    w_out = p["w_out"].T.astype(jnp.bfloat16)            # [di, C]

    weights = [w_in_x, w_in_z, p["conv_w"], p["conv_b"], w_b, w_c, a, a_t,
               p["Dp"], w_out, p["ln_w"], p["ln_b"]]

    def resident_spec(w):
        zeros = (0,) * w.ndim
        return pl.BlockSpec(w.shape, lambda n: zeros)    # VMEM-resident across the grid

    kernel = _make_kernel(Nb, Lp, T, C, K, di, ds)
    grid = (N_pad // Nb,)

    out_r = pl.pallas_call(
        kernel,
        out_shape=jax.ShapeDtypeStruct((N_pad, Lp, C), jnp.float32),
        grid=grid,
        in_specs=[pl.BlockSpec((Nb, Lp, C), lambda n: (n, 0, 0))]
                 + [resident_spec(w) for w in weights],
        out_specs=pl.BlockSpec((Nb, Lp, C), lambda n: (n, 0, 0)),
        compiler_params=pltpu.CompilerParams(
            dimension_semantics=("parallel",),
            vmem_limit_bytes=int(cfg["vmem_cap"])),
    )(x_r, *weights)

    return out_r[:N, :T, :].reshape(B, T, J, C)


# --------------------------------------------------------------------------------------
# Pure-JAX reference (mirrors the PyTorch module; bf16 matmul operands like the kernel)
# --------------------------------------------------------------------------------------
def reference_forward(x, p, bf16_matmul=True):
    """With bf16_matmul=True the matmul operands are rounded to bf16 (f32 accumulation),
    the same MXU-native path the kernel uses, so the self-test runs at a tight tolerance.
    Against a strict f32 PyTorch reference the error would be larger (bf16 rounding)."""
    def mdot(a, b):
        if bf16_matmul:
            a = a.astype(jnp.bfloat16)
            b = b.astype(jnp.bfloat16)
        return jnp.dot(a, b, preferred_element_type=jnp.float32,
                       precision=jax.lax.Precision.HIGHEST)

    B, T, J, C = x.shape
    di = p["Dp"].shape[-1]
    ds = p["A"].shape[-1]
    K = p["conv_w"].shape[0]
    xr = x.reshape(B * J, T, C)
    xp = mdot(xr, p["w_in"][:di].T)
    z = mdot(xr, p["w_in"][di:].T)
    xc = jnp.zeros_like(xp)
    for k in range(K):
        shift = K - 1 - k
        if shift == 0:
            shifted = xp
        else:
            shifted = jnp.pad(xp[:, :T - shift, :], ((0, 0), (shift, 0), (0, 0)))
        xc = xc + shifted * p["conv_w"][k][None, None, :]
    xc = xc + p["conv_b"][0]
    xc = xc * jax.nn.sigmoid(xc)
    # dt = softplus(dt_proj(xc)) is dead code in SimplifiedMamba.selective_scan.
    bp = mdot(xc, p["w_xp"][:ds].T)
    cp = mdot(xc, p["w_xp"][ds:].T)
    gt = xc.mean(axis=1)
    gs = mdot(gt, p["A"])
    sm = gs[:, None, :] * bp * cp
    ss = mdot(sm, p["A"].T) + xc * p["Dp"][0]
    y = ss * (z * jax.nn.sigmoid(z))
    yo = mdot(y, p["w_out"].T)
    h = yo.reshape(B, T, J, C) + x
    mu = h.mean(-1, keepdims=True)
    var = ((h - mu) ** 2).mean(-1, keepdims=True)
    return (h - mu) / jnp.sqrt(var + 1e-5) * p["ln_w"][0] + p["ln_b"][0]


if __name__ == "__main__":
    key = jax.random.PRNGKey(0)
    k_x, k_p = jax.random.split(key)
    B, T, J, C = 2, 8, 4, 32          # batch, time, joints, channels
    x = jax.random.normal(k_x, (B, T, J, C), jnp.float32)
    params = init_params(k_p, C)

    out = jax.block_until_ready(mamba_branch_forward(x, params))
    ref = reference_forward(x, params)

    # Tolerance is bounded by the deliberate bf16-MXU-operand path (mirrored in the
    # reference) plus EUP transcendental rounding.
    np.testing.assert_allclose(np.asarray(out), np.asarray(ref), rtol=2e-3, atol=2e-3)
    print("KERNEL_OK")
</pallas_src>

<mosaic_0001>
module attributes {stable_mosaic.version = 11 : i64} {
  func.func @kernel(%arg0: i32, %arg1: memref<4x8x32xf32, #tpu.memory_space<vmem>>, %arg2: memref<32x64xbf16, #tpu.memory_space<vmem>>, %arg3: memref<32x64xbf16, #tpu.memory_space<vmem>>, %arg4: memref<4x64xf32, #tpu.memory_space<vmem>>, %arg5: memref<1x64xf32, #tpu.memory_space<vmem>>, %arg6: memref<64x16xbf16, #tpu.memory_space<vmem>>, %arg7: memref<64x16xbf16, #tpu.memory_space<vmem>>, %arg8: memref<64x16xbf16, #tpu.memory_space<vmem>>, %arg9: memref<16x64xbf16, #tpu.memory_space<vmem>>, %arg10: memref<1x64xf32, #tpu.memory_space<vmem>>, %arg11: memref<64x32xbf16, #tpu.memory_space<vmem>>, %arg12: memref<1x32xf32, #tpu.memory_space<vmem>>, %arg13: memref<1x32xf32, #tpu.memory_space<vmem>>, %arg14: memref<4x8x32xf32, #tpu.memory_space<vmem>>) attributes {dimension_semantics = [#tpu.dimension_semantics<parallel>], iteration_bounds = array<i64: 2>, scalar_prefetch = 0 : i64, scratch_operands = 0 : i64, tpu.core_type = #tpu.core_type<tc>, window_params = [{transform_indices = @transform_0, window_bounds = array<i64: 4, 8, 32>}, {pipeline_mode = #tpu.pipeline_mode<synchronous>, transform_indices = @transform_1, window_bounds = array<i64: 32, 64>}, {pipeline_mode = #tpu.pipeline_mode<synchronous>, transform_indices = @transform_2, window_bounds = array<i64: 32, 64>}, {pipeline_mode = #tpu.pipeline_mode<synchronous>, transform_indices = @transform_3, window_bounds = array<i64: 4, 64>}, {pipeline_mode = #tpu.pipeline_mode<synchronous>, transform_indices = @transform_4, window_bounds = array<i64: 1, 64>}, {pipeline_mode = #tpu.pipeline_mode<synchronous>, transform_indices = @transform_5, window_bounds = array<i64: 64, 16>}, {pipeline_mode = #tpu.pipeline_mode<synchronous>, transform_indices = @transform_6, window_bounds = array<i64: 64, 16>}, {pipeline_mode = #tpu.pipeline_mode<synchronous>, transform_indices = @transform_7, window_bounds = array<i64: 64, 16>}, {pipeline_mode = #tpu.pipeline_mode<synchronous>, transform_indices = @transform_8, window_bounds = array<i64: 16, 64>}, {pipeline_mode = #tpu.pipeline_mode<synchronous>, transform_indices = @transform_9, window_bounds = array<i64: 1, 64>}, {pipeline_mode = #tpu.pipeline_mode<synchronous>, transform_indices = @transform_10, window_bounds = array<i64: 64, 32>}, {pipeline_mode = #tpu.pipeline_mode<synchronous>, transform_indices = @transform_11, window_bounds = array<i64: 1, 32>}, {pipeline_mode = #tpu.pipeline_mode<synchronous>, transform_indices = @transform_12, window_bounds = array<i64: 1, 32>}, {transform_indices = @transform_13, window_bounds = array<i64: 4, 8, 32>}]} {
    %c0 = arith.constant 0 : index
    %c0_0 = arith.constant 0 : index
    %c0_1 = arith.constant 0 : index
    %0 = vector.load %arg1[%c0, %c0_0, %c0_1] : memref<4x8x32xf32, #tpu.memory_space<vmem>>, vector<4x8x32xf32>
    %1 = vector.shape_cast %0 : vector<4x8x32xf32> to vector<32x32xf32>
    %2 = arith.truncf %1 : vector<32x32xf32> to vector<32x32xbf16>
    %c0_2 = arith.constant 0 : index
    %c0_3 = arith.constant 0 : index
    %3 = vector.load %arg2[%c0_2, %c0_3] : memref<32x64xbf16, #tpu.memory_space<vmem>>, vector<32x64xbf16>
    %cst = arith.constant dense<0.000000e+00> : vector<32x64xf32>
    %4 = tpu.matmul %2, %3, %cst {dimension_numbers = #tpu.dot_dimension_numbers<[1], [0], [0], [1], [0, 0, 1, 1], [], []>} : vector<32x32xbf16>, vector<32x64xbf16>, vector<32x64xf32> -> vector<32x64xf32>
    %c0_4 = arith.constant 0 : index
    %c0_5 = arith.constant 0 : index
    %5 = vector.load %arg3[%c0_4, %c0_5] : memref<32x64xbf16, #tpu.memory_space<vmem>>, vector<32x64xbf16>
    %cst_6 = arith.constant dense<0.000000e+00> : vector<32x64xf32>
    %6 = tpu.matmul %2, %5, %cst_6 {dimension_numbers = #tpu.dot_dimension_numbers<[1], [0], [0], [1], [0, 0, 1, 1], [], []>} : vector<32x32xbf16>, vector<32x64xbf16>, vector<32x64xf32> -> vector<32x64xf32>
    %7 = tpu.iota {dimensions = array<i32: 1>} : vector<4x8x1xi32>
    %c0_7 = arith.constant 0 : index
    %c0_8 = arith.constant 0 : index
    %8 = vector.load %arg4[%c0_7, %c0_8] : memref<4x64xf32, #tpu.memory_space<vmem>>, vector<4x64xf32>
    %9 = vector.extract_strided_slice %8 {offsets = [3, 0], sizes = [1, 64], strides = [1, 1]} : vector<4x64xf32> to vector<1x64xf32>
    %10 = vector.broadcast %9 : vector<1x64xf32> to vector<32x64xf32>
    %11 = arith.mulf %4, %10 : vector<32x64xf32>
    %c3_i32 = arith.constant 3 : i32
    %12 = tpu.dynamic_rotate %4 by %c3_i32 dim 0 : vector<32x64xf32>, i32 -> vector<32x64xf32>
    %13 = vector.extract_strided_slice %8 {offsets = [0, 0], sizes = [1, 64], strides = [1, 1]} : vector<4x64xf32> to vector<1x64xf32>
    %14 = vector.broadcast %13 : vector<1x64xf32> to vector<32x64xf32>
    %15 = arith.mulf %12, %14 : vector<32x64xf32>
    %c3_i32_9 = arith.constant 3 : i32
    %16 = vector.broadcast %c3_i32_9 : i32 to vector<4x8x1xi32>
    %17 = arith.cmpi sge, %7, %16 : vector<4x8x1xi32>
    %18 = vector.shape_cast %15 : vector<32x64xf32> to vector<4x8x64xf32>
    %cst_10 = arith.constant 0.000000e+00 : f32
    %19 = vector.shape_cast %17 : vector<4x8x1xi1> to vector<4x8x1xi1>
    %20 = vector.broadcast %19 : vector<4x8x1xi1> to vector<4x8x64xi1>
    %21 = vector.broadcast %cst_10 : f32 to vector<4x8x64xf32>
    %22 = arith.select %20, %18, %21 : vector<4x8x64xi1>, vector<4x8x64xf32>
    %23 = vector.shape_cast %22 : vector<4x8x64xf32> to vector<32x64xf32>
    %24 = arith.addf %11, %23 : vector<32x64xf32>
    %c2_i32 = arith.constant 2 : i32
    %25 = tpu.dynamic_rotate %4 by %c2_i32 dim 0 : vector<32x64xf32>, i32 -> vector<32x64xf32>
    %26 = vector.extract_strided_slice %8 {offsets = [1, 0], sizes = [1, 64], strides = [1, 1]} : vector<4x64xf32> to vector<1x64xf32>
    %27 = vector.broadcast %26 : vector<1x64xf32> to vector<32x64xf32>
    %28 = arith.mulf %25, %27 : vector<32x64xf32>
    %c2_i32_11 = arith.constant 2 : i32
    %29 = vector.broadcast %c2_i32_11 : i32 to vector<4x8x1xi32>
    %30 = arith.cmpi sge, %7, %29 : vector<4x8x1xi32>
    %31 = vector.shape_cast %28 : vector<32x64xf32> to vector<4x8x64xf32>
    %cst_12 = arith.constant 0.000000e+00 : f32
    %32 = vector.shape_cast %30 : vector<4x8x1xi1> to vector<4x8x1xi1>
    %33 = vector.broadcast %32 : vector<4x8x1xi1> to vector<4x8x64xi1>
    %34 = vector.broadcast %cst_12 : f32 to vector<4x8x64xf32>
    %35 = arith.select %33, %31, %34 : vector<4x8x64xi1>, vector<4x8x64xf32>
    %36 = vector.shape_cast %35 : vector<4x8x64xf32> to vector<32x64xf32>
    %37 = arith.addf %24, %36 : vector<32x64xf32>
    %c1_i32 = arith.constant 1 : i32
    %38 = tpu.dynamic_rotate %4 by %c1_i32 dim 0 : vector<32x64xf32>, i32 -> vector<32x64xf32>
    %39 = vector.extract_strided_slice %8 {offsets = [2, 0], sizes = [1, 64], strides = [1, 1]} : vector<4x64xf32> to vector<1x64xf32>
    %40 = vector.broadcast %39 : vector<1x64xf32> to vector<32x64xf32>
    %41 = arith.mulf %38, %40 : vector<32x64xf32>
    %c1_i32_13 = arith.constant 1 : i32
    %42 = vector.broadcast %c1_i32_13 : i32 to vector<4x8x1xi32>
    %43 = arith.cmpi sge, %7, %42 : vector<4x8x1xi32>
    %44 = vector.shape_cast %41 : vector<32x64xf32> to vector<4x8x64xf32>
    %cst_14 = arith.constant 0.000000e+00 : f32
    %45 = vector.shape_cast %43 : vector<4x8x1xi1> to vector<4x8x1xi1>
    %46 = vector.broadcast %45 : vector<4x8x1xi1> to vector<4x8x64xi1>
    %47 = vector.broadcast %cst_14 : f32 to vector<4x8x64xf32>
    %48 = arith.select %46, %44, %47 : vector<4x8x64xi1>, vector<4x8x64xf32>
    %49 = vector.shape_cast %48 : vector<4x8x64xf32> to vector<32x64xf32>
    %50 = arith.addf %37, %49 : vector<32x64xf32>
    %c0_15 = arith.constant 0 : index
    %c0_16 = arith.constant 0 : index
    %51 = vector.load %arg5[%c0_15, %c0_16] : memref<1x64xf32, #tpu.memory_space<vmem>>, vector<1x64xf32>
    %52 = vector.broadcast %51 : vector<1x64xf32> to vector<32x64xf32>
    %53 = arith.addf %50, %52 : vector<32x64xf32>
    %54 = arith.negf %53 : vector<32x64xf32>
    %55 = math.exp %54 : vector<32x64xf32>
    %cst_17 = arith.constant 1.000000e+00 : f32
    %56 = vector.broadcast %cst_17 : f32 to vector<32x64xf32>
    %57 = arith.addf %56, %55 : vector<32x64xf32>
    %58 = arith.divf %56, %57 : vector<32x64xf32>
    %59 = arith.mulf %53, %58 : vector<32x64xf32>
    %60 = arith.truncf %59 : vector<32x64xf32> to vector<32x64xbf16>
    %c0_18 = arith.constant 0 : index
    %c0_19 = arith.constant 0 : index
    %61 = vector.load %arg6[%c0_18, %c0_19] : memref<64x16xbf16, #tpu.memory_space<vmem>>, vector<64x16xbf16>
    %cst_20 = arith.constant dense<0.000000e+00> : vector<32x16xf32>
    %62 = tpu.matmul %60, %61, %cst_20 {dimension_numbers = #tpu.dot_dimension_numbers<[1], [0], [0], [1], [0, 0, 1, 1], [], []>} : vector<32x64xbf16>, vector<64x16xbf16>, vector<32x16xf32> -> vector<32x16xf32>
    %c0_21 = arith.constant 0 : index
    %c0_22 = arith.constant 0 : index
    %63 = vector.load %arg7[%c0_21, %c0_22] : memref<64x16xbf16, #tpu.memory_space<vmem>>, vector<64x16xbf16>
    %cst_23 = arith.constant dense<0.000000e+00> : vector<32x16xf32>
    %64 = tpu.matmul %60, %63, %cst_23 {dimension_numbers = #tpu.dot_dimension_numbers<[1], [0], [0], [1], [0, 0, 1, 1], [], []>} : vector<32x64xbf16>, vector<64x16xbf16>, vector<32x16xf32> -> vector<32x16xf32>
    %65 = vector.shape_cast %59 : vector<32x64xf32> to vector<4x8x64xf32>
    %cst_24 = arith.constant dense<0.000000e+00> : vector<4x64xf32>
    %66 = vector.multi_reduction <add>, %65, %cst_24 [1] : vector<4x8x64xf32> to vector<4x64xf32>
    %cst_25 = arith.constant 8.000000e+00 : f32
    %67 = vector.broadcast %cst_25 : f32 to vector<4x64xf32>
    %68 = arith.divf %66, %67 : vector<4x64xf32>
    %69 = arith.truncf %68 : vector<4x64xf32> to vector<4x64xbf16>
    %c0_26 = arith.constant 0 : index
    %c0_27 = arith.constant 0 : index
    %70 = vector.load %arg8[%c0_26, %c0_27] : memref<64x16xbf16, #tpu.memory_space<vmem>>, vector<64x16xbf16>
    %cst_28 = arith.constant dense<0.000000e+00> : vector<4x16xf32>
    %71 = tpu.matmul %69, %70, %cst_28 {dimension_numbers = #tpu.dot_dimension_numbers<[1], [0], [0], [1], [0, 0, 1, 1], [], []>} : vector<4x64xbf16>, vector<64x16xbf16>, vector<4x16xf32> -> vector<4x16xf32>
    %72 = vector.shape_cast %71 : vector<4x16xf32> to vector<4x1x16xf32>
    %73 = vector.shape_cast %62 : vector<32x16xf32> to vector<4x8x16xf32>
    %74 = vector.broadcast %72 : vector<4x1x16xf32> to vector<4x8x16xf32>
    %75 = arith.mulf %74, %73 : vector<4x8x16xf32>
    %76 = vector.shape_cast %64 : vector<32x16xf32> to vector<4x8x16xf32>
    %77 = arith.mulf %75, %76 : vector<4x8x16xf32>
    %78 = vector.shape_cast %77 : vector<4x8x16xf32> to vector<32x16xf32>
    %79 = arith.truncf %78 : vector<32x16xf32> to vector<32x16xbf16>
    %c0_29 = arith.constant 0 : index
    %c0_30 = arith.constant 0 : index
    %80 = vector.load %arg9[%c0_29, %c0_30] : memref<16x64xbf16, #tpu.memory_space<vmem>>, vector<16x64xbf16>
    %cst_31 = arith.constant dense<0.000000e+00> : vector<32x64xf32>
    %81 = tpu.matmul %79, %80, %cst_31 {dimension_numbers = #tpu.dot_dimension_numbers<[1], [0], [0], [1], [0, 0, 1, 1], [], []>} : vector<32x16xbf16>, vector<16x64xbf16>, vector<32x64xf32> -> vector<32x64xf32>
    %c0_32 = arith.constant 0 : index
    %c0_33 = arith.constant 0 : index
    %82 = vector.load %arg10[%c0_32, %c0_33] : memref<1x64xf32, #tpu.memory_space<vmem>>, vector<1x64xf32>
    %83 = vector.broadcast %82 : vector<1x64xf32> to vector<32x64xf32>
    %84 = arith.mulf %59, %83 : vector<32x64xf32>
    %85 = arith.addf %81, %84 : vector<32x64xf32>
    %86 = arith.negf %6 : vector<32x64xf32>
    %87 = math.exp %86 : vector<32x64xf32>
    %cst_34 = arith.constant 1.000000e+00 : f32
    %88 = vector.broadcast %cst_34 : f32 to vector<32x64xf32>
    %89 = arith.addf %88, %87 : vector<32x64xf32>
    %90 = arith.divf %88, %89 : vector<32x64xf32>
    %91 = arith.mulf %6, %90 : vector<32x64xf32>
    %92 = arith.mulf %85, %91 : vector<32x64xf32>
    %93 = arith.truncf %92 : vector<32x64xf32> to vector<32x64xbf16>
    %c0_35 = arith.constant 0 : index
    %c0_36 = arith.constant 0 : index
    %94 = vector.load %arg11[%c0_35, %c0_36] : memref<64x32xbf16, #tpu.memory_space<vmem>>, vector<64x32xbf16>
    %cst_37 = arith.constant dense<0.000000e+00> : vector<32x32xf32>
    %95 = tpu.matmul %93, %94, %cst_37 {dimension_numbers = #tpu.dot_dimension_numbers<[1], [0], [0], [1], [0, 0, 1, 1], [], []>} : vector<32x64xbf16>, vector<64x32xbf16>, vector<32x32xf32> -> vector<32x32xf32>
    %96 = arith.addf %95, %1 : vector<32x32xf32>
    %cst_38 = arith.constant dense<0.000000e+00> : vector<32xf32>
    %97 = vector.multi_reduction <add>, %96, %cst_38 [1] : vector<32x32xf32> to vector<32xf32>
    %98 = vector.shape_cast %97 : vector<32xf32> to vector<32x1xf32>
    %cst_39 = arith.constant 3.200000e+01 : f32
    %99 = vector.broadcast %cst_39 : f32 to vector<32x1xf32>
    %100 = arith.divf %98, %99 : vector<32x1xf32>
    %101 = vector.broadcast %100 : vector<32x1xf32> to vector<32x32xf32>
    %102 = arith.subf %96, %101 : vector<32x32xf32>
    %103 = arith.mulf %102, %102 : vector<32x32xf32>
    %cst_40 = arith.constant dense<0.000000e+00> : vector<32xf32>
    %104 = vector.multi_reduction <add>, %103, %cst_40 [1] : vector<32x32xf32> to vector<32xf32>
    %105 = vector.shape_cast %104 : vector<32xf32> to vector<32x1xf32>
    %cst_41 = arith.constant 3.200000e+01 : f32
    %106 = vector.broadcast %cst_41 : f32 to vector<32x1xf32>
    %107 = arith.divf %105, %106 : vector<32x1xf32>
    %108 = vector.broadcast %100 : vector<32x1xf32> to vector<32x32xf32>
    %109 = arith.subf %96, %108 : vector<32x32xf32>
    %cst_42 = arith.constant 9.99999974E-6 : f32
    %110 = vector.broadcast %cst_42 : f32 to vector<32x1xf32>
    %111 = arith.addf %107, %110 : vector<32x1xf32>
    %112 = math.rsqrt %111 : vector<32x1xf32>
    %113 = vector.broadcast %112 : vector<32x1xf32> to vector<32x32xf32>
    %114 = arith.mulf %109, %113 : vector<32x32xf32>
    %c0_43 = arith.constant 0 : index
    %c0_44 = arith.constant 0 : index
    %115 = vector.load %arg12[%c0_43, %c0_44] : memref<1x32xf32, #tpu.memory_space<vmem>>, vector<1x32xf32>
    %116 = vector.broadcast %115 : vector<1x32xf32> to vector<32x32xf32>
    %117 = arith.mulf %114, %116 : vector<32x32xf32>
    %c0_45 = arith.constant 0 : index
    %c0_46 = arith.constant 0 : index
    %118 = vector.load %arg13[%c0_45, %c0_46] : memref<1x32xf32, #tpu.memory_space<vmem>>, vector<1x32xf32>
    %119 = vector.broadcast %118 : vector<1x32xf32> to vector<32x32xf32>
    %120 = arith.addf %117, %119 : vector<32x32xf32>
    %121 = vector.shape_cast %120 : vector<32x32xf32> to vector<4x8x32xf32>
    %c0_47 = arith.constant 0 : index
    %c0_48 = arith.constant 0 : index
    %c0_49 = arith.constant 0 : index
    %122 = vector.load %arg14[%c0_47, %c0_48, %c0_49] : memref<4x8x32xf32, #tpu.memory_space<vmem>>, vector<4x8x32xf32>
    tpu.vector_store %arg14[%c0_47, %c0_48, %c0_49], %121 {strides = array<i32>} : memref<4x8x32xf32, #tpu.memory_space<vmem>>, vector<4x8x32xf32>,
    return
  }
  func.func @transform_0(%arg0: i32) -> (i32, i32, i32) {
    %c0_i32 = arith.constant 0 : i32
    %c0_i32_0 = arith.constant 0 : i32
    %c0_i32_1 = arith.constant 0 : i32
    return %arg0, %c0_i32, %c0_i32_0 : i32, i32, i32
  }
  func.func @transform_1(%arg0: i32) -> (i32, i32) {
    %c0_i32 = arith.constant 0 : i32
    %c0_i32_0 = arith.constant 0 : i32
    %c0_i32_1 = arith.constant 0 : i32
    return %c0_i32, %c0_i32_0 : i32, i32
  }
  func.func @transform_2(%arg0: i32) -> (i32, i32) {
    %c0_i32 = arith.constant 0 : i32
    %c0_i32_0 = arith.constant 0 : i32
    %c0_i32_1 = arith.constant 0 : i32
    return %c0_i32, %c0_i32_0 : i32, i32
  }
  func.func @transform_3(%arg0: i32) -> (i32, i32) {
    %c0_i32 = arith.constant 0 : i32
    %c0_i32_0 = arith.constant 0 : i32
    %c0_i32_1 = arith.constant 0 : i32
    return %c0_i32, %c0_i32_0 : i32, i32
  }
  func.func @transform_4(%arg0: i32) -> (i32, i32) {
    %c0_i32 = arith.constant 0 : i32
    %c0_i32_0 = arith.constant 0 : i32
    %c0_i32_1 = arith.constant 0 : i32
    return %c0_i32, %c0_i32_0 : i32, i32
  }
  func.func @transform_5(%arg0: i32) -> (i32, i32) {
    %c0_i32 = arith.constant 0 : i32
    %c0_i32_0 = arith.constant 0 : i32
    %c0_i32_1 = arith.constant 0 : i32
    return %c0_i32, %c0_i32_0 : i32, i32
  }
  func.func @transform_6(%arg0: i32) -> (i32, i32) {
    %c0_i32 = arith.constant 0 : i32
    %c0_i32_0 = arith.constant 0 : i32
    %c0_i32_1 = arith.constant 0 : i32
    return %c0_i32, %c0_i32_0 : i32, i32
  }
  func.func @transform_7(%arg0: i32) -> (i32, i32) {
    %c0_i32 = arith.constant 0 : i32
    %c0_i32_0 = arith.constant 0 : i32
    %c0_i32_1 = arith.constant 0 : i32
    return %c0_i32, %c0_i32_0 : i32, i32
  }
  func.func @transform_8(%arg0: i32) -> (i32, i32) {
    %c0_i32 = arith.constant 0 : i32
    %c0_i32_0 = arith.constant 0 : i32
    %c0_i32_1 = arith.constant 0 : i32
    return %c0_i32, %c0_i32_0 : i32, i32
  }
  func.func @transform_9(%arg0: i32) -> (i32, i32) {
    %c0_i32 = arith.constant 0 : i32
    %c0_i32_0 = arith.constant 0 : i32
    %c0_i32_1 = arith.constant 0 : i32
    return %c0_i32, %c0_i32_0 : i32, i32
  }
  func.func @transform_10(%arg0: i32) -> (i32, i32) {
    %c0_i32 = arith.constant 0 : i32
    %c0_i32_0 = arith.constant 0 : i32
    %c0_i32_1 = arith.constant 0 : i32
    return %c0_i32, %c0_i32_0 : i32, i32
  }
  func.func @transform_11(%arg0: i32) -> (i32, i32) {
    %c0_i32 = arith.constant 0 : i32
    %c0_i32_0 = arith.constant 0 : i32
    %c0_i32_1 = arith.constant 0 : i32
    return %c0_i32, %c0_i32_0 : i32, i32
  }
  func.func @transform_12(%arg0: i32) -> (i32, i32) {
    %c0_i32 = arith.constant 0 : i32
    %c0_i32_0 = arith.constant 0 : i32
    %c0_i32_1 = arith.constant 0 : i32
    return %c0_i32, %c0_i32_0 : i32, i32
  }
  func.func @transform_13(%arg0: i32) -> (i32, i32, i32) {
    %c0_i32 = arith.constant 0 : i32
    %c0_i32_0 = arith.constant 0 : i32
    %c0_i32_1 = arith.constant 0 : i32
    return %arg0, %c0_i32, %c0_i32_0 : i32, i32, i32
  }
}

</mosaic_0001>

<bundles_post_ra>
// kernel: tpu_custom_call.1
= control target key start
LH: loop header
LB: loop body
LE: loop exit
PB: predicated region body
PF: predicated region fallthrough
CT: control target
= control target key end

     0   :  { %s2119_s0 = inlined_call_operand.vmem [shape: f32[8,8,32], index: 0, kind: input, shape index: {}]   ;;  %s2120_s1 = inlined_call_operand.vmem [shape: bf16[32,64], index: 1, kind: input, shape index: {}]   ;;  %s2121_s2 = inlined_call_operand.vmem [shape: bf16[32,64], index: 2, kind: input, shape index: {}]   ;;  %s2122_s3 = inlined_call_operand.vmem [shape: f32[4,64], index: 3, kind: input, shape index: {}]   ;;  %s2123_s4 = inlined_call_operand.vmem [shape: f32[1,64], index: 4, kind: input, shape index: {}]   ;;  %s2124_s5 = inlined_call_operand.vmem [shape: bf16[64,16], index: 5, kind: input, shape index: {}]   ;;  %s2125_s6 = inlined_call_operand.vmem [shape: bf16[64,16], index: 6, kind: input, shape index: {}]   ;;  %s2126_s7 = inlined_call_operand.vmem [shape: bf16[64,16], index: 7, kind: input, shape index: {}]   ;;  %s2127_s8 = inlined_call_operand.vmem [shape: bf16[16,64], index: 8, kind: input, shape index: {}]   ;;  %s2128_s9 = inlined_call_operand.vmem [shape: f32[1,64], index: 9, kind: input, shape index: {}]   ;;  %s2129_s10 = inlined_call_operand.vmem [shape: bf16[64,32], index: 10, kind: input, shape index: {}]   ;;  %s2130_s11 = inlined_call_operand.vmem [shape: f32[1,32], index: 11, kind: input, shape index: {}]   ;;  %s2131_s12 = inlined_call_operand.vmem [shape: f32[1,32], index: 12, kind: input, shape index: {}]   ;;  %s2132_s13 = inlined_call_operand.hbm [shape: f32[8,8,32], index: 13, kind: output, shape index: {}]  }
   0x1   :  { %2133 = sst [smem:[#allocation6_spill]] %s2119_s0 }
   0x2   :  { %2134 = sst [smem:[#allocation7_spill]] %s2120_s1 }
   0x3   :  { %18 = vsyncpa [#allocation3], 0 }
   0x4   :  { %20 = vsyncpa [#allocation3 + $0x1], 0  ;;  %s1686_s25 = smov 0   ;;  %s1688_s26 = smov 0  }
   0x5   :  { %s1690_s27 = smov 0   ;;  %s1692_s28 = smov 0  }
   0x6 LB: > { %s1707_s29 = sadd.s32 4294967295, %s1610_s28   ;;  %s1314_s30 = sadd.s32 4294967294, %s1610_s28   ;;  %s1610_s28 = sphi %s1692_s28, %s2146_s28   ;;  %s1606_s27 = sphi %s1690_s27, %s2145_s27   ;;  %s1602_s26 = sphi %s1688_s26, %s2144_s26   ;;  %s1598_s25 = sphi %s1686_s25, %s2143_s25  }
   0x7   : > { %s1711_s14 = sadd.s32 1, %s1610_s28   ;;  %s311_s15 = sadd.s32 1, %s1606_s27 }
   0x8   : > { %s308_s16 = ssub.s32 %s1610_s28, %s1711_s14  ;;  %p321_p0 = scmp.ne.s32.totalorder %s1606_s27, %s1602_s26 }
   0x9   : > { %p309_p1 = scmp.eq.s32.totalorder %s308_s16, 0  ;;  %p322_p2 = scmp.eq.s32.totalorder %s1707_s29, 1 }
   0xa   : > { %p327_p3 = scmp.ne.s32.totalorder %s1602_s26, %s1598_s25  ;;  %p328_p4 = scmp.eq.s32.totalorder %s1314_s30, 1 }
   0xb   : > { %s1722_s17 = scalar_select %p309_p1, %s1606_s27, %s311_s15  }
   0xc   : > { %p1724_p5 = por %p322_p2, %p321_p0  ;;  %p1728_p6 = por %p328_p4, %p327_p3 }
   0xd   : > { %2135 = sst [smem:[#allocation5_spill]] %s1722_s17  ;;  %p1317_p7 = scmp.ge.s32.totalorder %s1610_s28, 1 }
   0xe   : > { %p391_p8 = scmp.lt.s32.totalorder %s1610_s28, 3 }
  0x10   : > { %p392_p9 = pnand %p1317_p7, %p391_p8 }
  0x11   : > { %s2138_s1 = sld [smem:[#allocation7_spill]] (!%p392_p9)  ;;  %s1319_s22 = sshll.u32 (!%p392_p9), %s1707_s29, 2 }
  0x12   : > { %395 = sbr.rel (%p392_p9) target bundleno = 958 (0x3be), region = 72  ;;  %p436_p10 = scmp.lt.s32.totalorder (!%p392_p9), %s1319_s22, 7 }
  0x13   : > { %s2139_s0 = sld [smem:[#allocation6_spill]] (!%p392_p9)  ;;  %s432_s16 = sand.u32 (!%p392_p9), 1, %s1602_s26  }
  0x14   : > { %s1237_s23 = scalar_lea.sflag (!%p392_p9), [#allocation3], %s432_s16 }
  0x17   : > { %v1432_v0 = vld [vmem:[%s2138_s1 + $0x8] sm:$0xff]  ;;  %v1431_v1 = vld [vmem:[%s2138_s1] sm:$0xff]  ;;  %s2148_s22 = smov (!%p436_p10, %s1319_s22), 7  ;;  %vm465_vm0 = vcmask 261120   ;;  %v526_v8 = vlaneseq  ;;  %v1438_v11 = vld [vmem:[%s2124_s5 + $0x18] sm:$0xff]  ;;  %vm731_vm11 = vcmask 523264  }
  0x18   : > { %478 = vmatpush.bf16.msra.mxu0 %v1432_v0  ;;  %s1320_s30 = sshll.u32 %s2148_s22, 3  ;;  %v1446_v12 = vld [vmem:[%s2126_s7 + $0x18] sm:$0xff]  ;;  %742 = vmatpush.bf16.msra.mxu2 %v1438_v11  ;;  %v1437_v13 = vld [vmem:[%s2124_s5 + $0x10] sm:$0xff]  ;;  %v528_v14 = vld [vmem:[%s2122_s3] sm:$0xf] }
  0x19   : > { %s439_s17 = scalar_lea.vmem %s2139_s0, %s1320_s30  ;;  %v1766_v10 = vshrl.u32 %v526_v8, 7  ;;  %1453 = vmatpush.bf16.msra.mxu3 %v1438_v11  ;;  %v1781_v15 = vperm.slane %v528_v14, 0  ;;  %v1786_v19 = vperm.slane %v528_v14, 1  ;;  %v1436_v24 = vld [vmem:[%s2124_s5 + $0x8] sm:$0xff]  ;;  %v529_v25 = vperm.slane %v528_v14, 3  ;;  %v1435_v33 = vld [vmem:[%s2124_s5] sm:$0xff] }
  0x1a   : > { %v1744_v2 = vld [vmem:[%s439_s17] sm:$0xff]  ;;  %v1746_v3 = vld [vmem:[%s439_s17 + $0x8] sm:$0xff]  ;;  %v1754_v5 = vld [vmem:[%s439_s17 + $0x10] sm:$0xff]  ;;  %v1793_v26 = vperm.slane %v528_v14, 2  ;;  %s1452_s30 = sshll.u32 %s1707_s29, 5  ;;  %s1568_s0 = scalar_lea.hbm %s2132_s13, 64 }
  0x1b   : > { %v1750_v4 = vpack.c.bf16 %v1746_v3, %v1744_v2  ;;  %v1756_v6 = vld [vmem:[%s439_s17 + $0x18] sm:$0xff]  ;;  %vm538_vm1 = vcmp.lt.s32.totalorder %v1766_v10, 3  ;;  %vm563_vm2 = vcmp.lt.s32.totalorder %v1766_v10, 2  ;;  %vm588_vm3 = vcmp.lt.s32.totalorder %v1766_v10, 1  ;;  %v1500_v42 = vld [vmem:[%s2123_s4] ss:$0 sm:$0xff]  ;;  %s1248_s21 = scalar_lea.hbm %s2132_s13, %s1452_s30 }
  0x1c   : > { %479 = vmatpush.bf16.msra.mxu0 %v1431_v1  ;;  %v1760_v7 = vpack.c.bf16 %v1756_v6, %v1754_v5  ;;  %743 = vmatpush.bf16.msra.mxu2 %v1437_v13  ;;  %vm548_vm4 = vcmp.ge.s32.totalorder %v1766_v10, 3  ;;  %vm573_vm5 = vcmp.ge.s32.totalorder %v1766_v10, 2  ;;  %vm598_vm6 = vcmp.ge.s32.totalorder %v1766_v10, 1  ;;  %v1442_v10 = vld [vmem:[%s2125_s6 + $0x18] sm:$0xff]  ;;  %s1318_s17 = sshll.u32 %s432_s16, 5  ;;  %s1251_s29 = sshll.u32 %s1248_s21, 4  ;;  %s1252_s29 = int_to_ptr.hbm [resolvable:$true] %s1251_s29 }
  0x1d   : > { %1454 = vmatpush.bf16.msra.mxu3 %v1437_v13  ;;  %s2072_s24 = scalar_lea.vmem [#allocation2], %s1318_s17  ;;  %s1562_s17 = sshra.s32 %s1252_s29, 4  ;;  %s1563_s17 = int_to_ptr.hbm [resolvable:$true] %s1562_s17 }
  0x1e   : > { %s1249_s22 = sshll.u32 %s2072_s24, 4  ;;  %s1564_s30 = scalar_lea.hbm %s1563_s17, 32  ;;  %s1250_s22 = int_to_ptr.vmem [resolvable:$true] %s1249_s22 }
  0x1f   : > { %1329 = vmatmul.msk.bf16.vlgmr.msra.gmra.mxu0 %vm465_vm0, %v1750_v4  ;;  %p1565_p11 = scmp.ne.s32.totalorder %s1563_s17, %s1564_s30  ;;  %p1569_p0 = scmp.lt.s32.totalorder %s1563_s17, %s2132_s13 }
  0x20   : > { %905 = vmatpush.bf16.msrb.mxu0 %v1446_v12  ;;  %744 = vmatpush.bf16.msra.mxu2 %v1436_v24  ;;  %p1570_p1 = scmp.lt.s32.totalorder %s1568_s0, %s1564_s30 }
  0x21   : > { %1455 = vmatpush.bf16.msra.mxu3 %v1436_v24  ;;  %p1566_p12 = pnand %p1565_p11, %p1724_p5 }
  0x22   : > { %p1571_p2 = por %p1570_p1, %p1569_p0 }
  0x23   : > { %p1567_p13 = pneg %p1566_p12 }
  0x24   : > { %745 = vmatpush.bf16.msra.mxu2 %v1435_v33 }
  0x25   : > { %1456 = vmatpush.bf16.msra.mxu3 %v1435_v33  ;;  %p1572_p3 = pnand %p1571_p2, %p1567_p13 }
  0x29   : > { %793 = vmatpush.bf16.msrb.mxu3 %v1442_v10 }
  0x2f   : > { %1330 = vmatmul.msk.bf16.gmra.mxu0 %vm465_vm0, %v1760_v7 }
  0x9c   : > { %v1764_v9 = vpop.f32.mrf.mxu0 }
  0x9d   : > { %v534_v16 = vrot.slane %v1764_v9, 5  ;;  %v559_v17 = vrot.slane %v1764_v9, 6  ;;  %v584_v20 = vrot.slane %v1764_v9, 7  ;;  %v530_v59 = vmul.f32 %v529_v25, %v1764_v9 }
  0xa4   : > { %v483_v18 = vpop.f32.mrf.mxu0 }
  0xa5   : > { %v535_v21 = vrot.slane %v483_v18, 5  ;;  %v560_v22 = vrot.slane %v483_v18, 6  ;;  %v585_v23 = vrot.slane %v483_v18, 7  ;;  %v531_v32 = vmul.f32 %v529_v25, %v483_v18 }
  0xa7   : > { %v541_v27 = vsel %vm538_vm1, %v534_v16, %v535_v21  ;;  %v566_v28 = vsel %vm563_vm2, %v559_v17, %v560_v22  ;;  %v591_v29 = vsel %vm588_vm3, %v584_v20, %v585_v23 }
  0xa8   : > { %v545_v30 = vmul.f32 %v1781_v15, %v541_v27  ;;  %v570_v31 = vmul.f32 %v1786_v19, %v566_v28  ;;  %v595_v35 = vmul.f32 %v1793_v26, %v591_v29 }
  0xaa   : > { %v552_v34 = vsel %vm548_vm4, %v545_v30, 0.0  ;;  %v577_v37 = vsel %vm573_vm5, %v570_v31, 0.0  ;;  %v602_v43 = vsel %vm598_vm6, %v595_v35, 0.0 }
  0xab   : > { %v556_v36 = vadd.f32 %v552_v34, %v531_v32 }
  0xac   : > { %v486_v38 = vpop.f32.mrf.mxu0 }
  0xad   : > { %v581_v39 = vadd.f32 %v577_v37, %v556_v36  ;;  %v536_v40 = vrot.slane %v486_v38, 5  ;;  %v561_v41 = vrot.slane %v486_v38, 6  ;;  %v586_v44 = vrot.slane %v486_v38, 7 }
  0xae   : > { %v532_v51 = vmul.f32 %v529_v25, %v486_v38 }
  0xaf   : > { %v606_v45 = vadd.f32 %v602_v43, %v581_v39  ;;  %v540_v46 = vsel %vm538_vm1, %v535_v21, %v536_v40  ;;  %v565_v47 = vsel %vm563_vm2, %v560_v22, %v561_v41  ;;  %v590_v50 = vsel %vm588_vm3, %v585_v23, %v586_v44 }
  0xb0   : > { %v546_v48 = vmul.f32 %v1781_v15, %v540_v46  ;;  %v571_v49 = vmul.f32 %v1786_v19, %v565_v47  ;;  %v596_v54 = vmul.f32 %v1793_v26, %v590_v50  ;;  %v1441_v47 = vld [vmem:[%s2125_s6 + $0x10] sm:$0xff] }
  0xb1   : > { %v1833_v52 = vadd.f32 %v1500_v42, %v606_v45  ;;  %794 = vmatpush.bf16.msrb.mxu3 %v1441_v47 }
  0xb2   : > { %v553_v53 = vsel %vm548_vm4, %v546_v48, 0.0  ;;  %v578_v57 = vsel %vm573_vm5, %v571_v49, 0.0  ;;  %v603_v63 = vsel %vm598_vm6, %v596_v54, 0.0 }
  0xb3   : > { %v557_v55 = vadd.f32 %v553_v53, %v532_v51  ;;  %v1342_v56 = vmul.f32 -1.442695, %v1833_v52 }
  0xb4   : > { %v488_v58 = vpop.f32.mrf.mxu0 }
  0xb5   : > { %v582_v60 = vadd.f32 %v578_v57, %v557_v55  ;;  %v537_v61 = vrot.slane %v488_v58, 5  ;;  %v562_v62 = vrot.slane %v488_v58, 6  ;;  %v533_v0 = vmul.f32 %v529_v25, %v488_v58  ;;  %v1440_v57 = vld [vmem:[%s2125_s6 + $0x8] sm:$0xff] }
  0xb6   : > { %v587_v1 = vrot.slane %v488_v58, 7  ;;  %1504 = vpow2.f32 %v1342_v56  ;;  %v1445_v56 = vld [vmem:[%s2126_s7 + $0x10] sm:$0xff]  ;;  %795 = vmatpush.bf16.msrb.mxu3 %v1440_v57 }
  0xb7   : > { %v607_v8 = vadd.f32 %v603_v63, %v582_v60  ;;  %v539_v11 = vsel %vm538_vm1, %v536_v40, %v537_v61  ;;  %v542_v12 = vsel %vm538_vm1, %v537_v61, %v534_v16  ;;  %v564_v13 = vsel %vm563_vm2, %v561_v41, %v562_v62  ;;  %906 = vmatpush.bf16.msrb.mxu0 %v1445_v56 }
  0xb8   : > { %v544_v14 = vmul.f32 %v1781_v15, %v542_v12  ;;  %v547_v18 = vmul.f32 %v1781_v15, %v539_v11  ;;  %v567_v21 = vsel %vm563_vm2, %v562_v62, %v559_v17  ;;  %v572_v22 = vmul.f32 %v1786_v19, %v564_v13  ;;  %v1444_v62 = vld [vmem:[%s2126_s7 + $0x8] sm:$0xff] }
  0xb9   : > { %v569_v23 = vmul.f32 %v1786_v19, %v567_v21  ;;  %v589_v24 = vsel %vm588_vm3, %v586_v44, %v587_v1  ;;  %v592_v16 = vsel %vm588_vm3, %v587_v1, %v584_v20  ;;  %v1866_v25 = vadd.f32 %v1500_v42, %v607_v8  ;;  %v1439_v1 = vld [vmem:[%s2125_s6] sm:$0xff] }
  0xba   : > { %v551_v15 = vsel %vm548_vm4, %v544_v14, 0.0  ;;  %v554_v17 = vsel %vm548_vm4, %v547_v18, 0.0  ;;  %v594_v27 = vmul.f32 %v1793_v26, %v592_v16  ;;  %v597_v29 = vmul.f32 %v1793_v26, %v589_v24  ;;  %796 = vmatpush.bf16.msrb.mxu3 %v1439_v1 }
  0xbb   : > { %v555_v28 = vadd.f32 %v551_v15, %v530_v59  ;;  %v558_v19 = vadd.f32 %v554_v17, %v533_v0  ;;  %v576_v9 = vsel %vm573_vm5, %v569_v23, 0.0  ;;  %v579_v20 = vsel %vm573_vm5, %v572_v22, 0.0  ;;  %907 = vmatpush.bf16.msrb.mxu0 %v1444_v62 }
  0xbc   : > { %v1505_v30 = vpop.eup %1504  ;;  %v1343_v31 = vmul.f32 -1.442695, %v1866_v25  ;;  %v601_v35 = vsel %vm598_vm6, %v594_v27, 0.0  ;;  %v604_v36 = vsel %vm598_vm6, %v597_v29, 0.0  ;;  %v1612_v60 = vmov 8.0  }
  0xbd   : > { %v580_v32 = vadd.f32 %v576_v9, %v555_v28  ;;  %v583_v33 = vadd.f32 %v579_v20, %v558_v19  ;;  %v630_v34 = vadd.f32 1.0, %v1505_v30 }
  0xbe   : > { %1506 = vpow2.f32 %v1343_v31 }
  0xbf   : > { %v608_v26 = vadd.f32 %v604_v36, %v583_v33  ;;  %v605_v37 = vadd.f32 %v601_v35, %v580_v32  ;;  %1508 = vrcp.f32 %v630_v34  ;;  %v659_v49 = vand.u32 2147483648, %v630_v34 }
  0xc0   : > { %v657_v51 = vand.u32 2147483647, %v630_v34  ;;  %vm653_vm8 = vweird.f32 %v630_v34 }
  0xc1   : > { %v1883_v38 = vadd.f32 %v1500_v42, %v605_v37  ;;  %v1885_v39 = vadd.f32 %v1500_v42, %v608_v26  ;;  %v660_v61 = vor.u32 1.1754944e-38, %v659_v49 }
  0xc2   : > { %vm658_vm10 = vcmp.eq.f32.partialorder %v657_v51, 8.507059e+37 }
  0xc3   : > { %v1341_v40 = vmul.f32 -1.442695, %v1883_v38  ;;  %v1344_v41 = vmul.f32 -1.442695, %v1885_v39 }
  0xc4   : > { %v1507_v43 = vpop.eup %1506 }
  0xc5   : > { %v1509_v44 = vpop.eup %1508  ;;  %1510 = vpow2.f32 %v1341_v40  ;;  %v1889_v45 = vadd.f32 1.0, %v1507_v43 }
  0xc6   : > { %v649_v46 = vmul.f32 %v1509_v44, %v630_v34  ;;  %1512 = vpow2.f32 %v1344_v41  ;;  %vm654_vm7 = vweird.f32 %v1509_v44 }
  0xc7   : > { %1514 = vrcp.f32 %v1889_v45  ;;  %vm655_vm9 = vmor %vm653_vm8, %vm654_vm7  ;;  %v674_v13 = vand.u32 2147483648, %v1889_v45  ;;  %v672_v22 = vand.u32 2147483647, %v1889_v45  ;;  %vm668_vm13 = vweird.f32 %v1889_v45 }
  0xc8   : > { %v650_v42 = vsub.f32 1.0, %v649_v46  ;;  %1516 = vrcp.f32 %v1612_v60 }
  0xc9   : > { %v675_v28 = vor.u32 1.1754944e-38, %v674_v13  ;;  %vm673_vm15 = vcmp.eq.f32.partialorder %v672_v22, 8.507059e+37 }
  0xca   : > { %v651_v48 = vmul.f32 %v1509_v44, %v650_v42 }
  0xcb   : > { %v1511_v50 = vpop.eup %1510 }
  0xcc   : > { %v1513_v53 = vpop.eup %1512  ;;  %v1898_v54 = vadd.f32 1.0, %v1511_v50  ;;  %v652_v55 = vadd.f32 %v1509_v44, %v651_v48 }
  0xcd   : > { %v1515_v58 = vpop.eup %1514  ;;  %v1906_v59 = vadd.f32 1.0, %v1513_v53 }
  0xce   : > { %1518 = vrcp.f32 %v1898_v54  ;;  %v656_v63 = vsel %vm655_vm9, %v1509_v44, %v652_v55  ;;  %v664_v0 = vmul.f32 %v1515_v58, %v1889_v45  ;;  %v1921_v14 = vpop.eup %1516  ;;  %vm669_vm12 = vweird.f32 %v1515_v58 }
  0xcf   : > { %1520 = vrcp.f32 %v1906_v59  ;;  %v661_v8 = vsel %vm658_vm10, %v660_v61, %v656_v63  ;;  %vm670_vm14 = vmor %vm668_vm13, %vm669_vm12  ;;  %v837_v29 = vmul.f32 8.0, %v1921_v14  ;;  %v642_v9 = vand.u32 2147483647, %v1898_v54 }
  0xd0   : > { %v1918_v11 = vmul.f32 %v661_v8, %v1833_v52  ;;  %v665_v12 = vsub.f32 1.0, %v664_v0  ;;  %v1443_v52 = vld [vmem:[%s2126_s7] sm:$0xff]  ;;  %v644_v31 = vand.u32 2147483648, %v1898_v54  ;;  %v689_v34 = vand.u32 2147483648, %v1906_v59  ;;  %v1434_v8 = vld [vmem:[%s2121_s2 + $0x8] sm:$0xff] }
  0xd1   : > { %908 = vmatpush.bf16.msrb.mxu0 %v1443_v52  ;;  %v687_v40 = vand.u32 2147483647, %v1906_v59  ;;  %vm638_vm3 = vweird.f32 %v1898_v54  ;;  %v838_v44 = vsub.f32 1.0, %v837_v29  ;;  %vm683_vm5 = vweird.f32 %v1906_v59  ;;  %513 = vmatpush.bf16.msra.mxu1 %v1434_v8  ;;  %v1447_v52 = vld [vmem:[%s2127_s8] sm:$0xff] }
  0xd2   : > { %v815_v18 = vsel %vm731_vm11, %v1918_v11, 0.0  ;;  %v666_v21 = vmul.f32 %v1515_v58, %v665_v12  ;;  %v645_v45 = vor.u32 1.1754944e-38, %v644_v31  ;;  %vm643_vm6 = vcmp.eq.f32.partialorder %v642_v9, 8.507059e+37 }
  0xd3   : > { %v816_v24 = vrot.slane %v815_v18, 4  ;;  %v690_v47 = vor.u32 1.1754944e-38, %v689_v34  ;;  %vm688_vm8 = vcmp.eq.f32.partialorder %v687_v40, 8.507059e+37  ;;  %vm841_vm9 = vweird.f32 %v1921_v14 }
  0xd4   : > { %v1519_v23 = vpop.eup %1518  ;;  %v667_v17 = vadd.f32 %v1515_v58, %v666_v21  ;;  %v1433_v21 = vld [vmem:[%s2121_s2] sm:$0xff]  ;;  %vm867_vm10 = vcmask 1041409   ;;  %vm869_vm12 = vcmask 1042434   ;;  %vm871_vm13 = vcmask 1043459  }
  0xd5   : > { %v1521_v16 = vpop.eup %1520  ;;  %v634_v15 = vmul.f32 %v1519_v23, %v1898_v54  ;;  %v817_v27 = vadd.f32 %v816_v24, %v815_v18  ;;  %vm639_vm1 = vweird.f32 %v1519_v23  ;;  %v839_v54 = vmul.f32 %v1921_v14, %v838_v44  ;;  %514 = vmatpush.bf16.msra.mxu1 %v1433_v21 }
  0xd6   : > { %v679_v19 = vmul.f32 %v1521_v16, %v1906_v59  ;;  %v671_v20 = vsel %vm670_vm14, %v1515_v58, %v667_v17  ;;  %vm684_vm2 = vweird.f32 %v1521_v16  ;;  %vm640_vm4 = vmor %vm638_vm3, %vm639_vm1  ;;  %vm952_vm14 = vcmask 130048  }
  0xd7   : > { %v635_v30 = vsub.f32 1.0, %v634_v15  ;;  %v676_v32 = vsel %vm673_vm15, %v675_v28, %v671_v20  ;;  %v818_v36 = vrot.slane %v817_v27, 2  ;;  %vm685_vm7 = vmor %vm683_vm5, %vm684_vm2  ;;  %v840_v63 = vadd.f32 %v1921_v14, %v839_v54 }
  0xd8   : > { %v680_v33 = vsub.f32 1.0, %v679_v19  ;;  %v1937_v26 = vmul.f32 %v676_v32, %v1866_v25  ;;  %1339 = vmatmul.msk.bf16.vlgmr.msra.gmra.mxu1 %vm465_vm0, %v1750_v4 }
  0xd9   : > { %v636_v35 = vmul.f32 %v1519_v23, %v635_v30  ;;  %v819_v25 = vadd.f32 %v818_v36, %v817_v27  ;;  %v842_v24 = vsel %vm841_vm9, %v1921_v14, %v840_v63  ;;  %966 = vmatpush.bf16.msrb.mxu1 %v1447_v52 }
  0xda   : > { %v681_v37 = vmul.f32 %v1521_v16, %v680_v33  ;;  %v822_v43 = vsel %vm731_vm11, %v1937_v26, 0.0 }
  0xdb   : > { %v637_v41 = vadd.f32 %v1519_v23, %v636_v35  ;;  %v823_v46 = vrot.slane %v822_v43, 4  ;;  %v820_v59 = vrot.slane %v819_v25, 1 }
  0xdc   : > { %v682_v10 = vadd.f32 %v1521_v16, %v681_v37 }
  0xdd   : > { %v641_v42 = vsel %vm640_vm4, %v1519_v23, %v637_v41  ;;  %v824_v50 = vadd.f32 %v823_v46, %v822_v43  ;;  %v821_v18 = vadd.f32 %v820_v59, %v819_v25 }
  0xde   : > { %v646_v48 = vsel %vm643_vm6, %v645_v45, %v641_v42  ;;  %v686_v49 = vsel %vm685_vm7, %v1521_v16, %v682_v10 }
  0xdf   : > { %v1945_v51 = vmul.f32 %v646_v48, %v1883_v38  ;;  %v691_v53 = vsel %vm688_vm8, %v690_v47, %v686_v49  ;;  %v825_v56 = vrot.slane %v824_v50, 2  ;;  %v844_v27 = vmul.f32 %v842_v24, %v821_v18 }
  0xe0   : > { %v1949_v55 = vmul.f32 %v691_v53, %v1885_v39 }
  0xe1   : > { %v697_v57 = vpack.c.bf16 %v1918_v11, %v1945_v51  ;;  %v808_v58 = vsel %vm731_vm11, %v1945_v51, 0.0  ;;  %v826_v38 = vadd.f32 %v825_v56, %v824_v50  ;;  %v848_v20 = vpack.c.bf16 %v844_v27, %v844_v27  ;;  %v1449_v27 = vld [vmem:[%s2129_s10 + $0x8] sm:$0xff] }
  0xe2   : > { %v809_v60 = vrot.slane %v808_v58, 4  ;;  %v698_v61 = vpack.c.bf16 %v1949_v55, %v1937_v26  ;;  %v829_v62 = vsel %vm731_vm11, %v1949_v55, 0.0 }
  0xe3   : > { %1361 = vmatmul.msk.bf16.vlgmr.msra.gmra.mxu2 %vm731_vm11, %v697_v57  ;;  %v830_v39 = vrot.slane %v829_v62, 4  ;;  %v827_v1 = vrot.slane %v826_v38, 1  ;;  %v864_v35 = vunpack.c.l.b16 %v848_v20 }
  0xe4   : > { %v810_v0 = vadd.f32 %v809_v60, %v808_v58  ;;  %1362 = vmatmul.msk.bf16.vlgmr.msra.gmra.mxu3 %vm731_vm11, %v698_v61 }
  0xe5   : > { %v831_v12 = vadd.f32 %v830_v39, %v829_v62  ;;  %v828_v23 = vadd.f32 %v827_v1, %v826_v38  ;;  %v1451_v38 = vld [vmem:[%s2129_s10 + $0x18] sm:$0xff] }
  0xe6   : > { %v811_v13 = vrot.slane %v810_v0, 2  ;;  %1106 = vmatpush.bf16.msrb.mxu2 %v1451_v38 }
  0xe7   : > { %v832_v22 = vrot.slane %v831_v12, 2  ;;  %v845_v19 = vmul.f32 %v842_v24, %v828_v23 }
  0xe8   : > { %v812_v16 = vadd.f32 %v811_v13, %v810_v0  ;;  %1340 = vmatmul.msk.bf16.gmra.mxu1 %vm465_vm0, %v1760_v7 }
  0xe9   : > { %v833_v15 = vadd.f32 %v832_v22, %v831_v12  ;;  %v849_v31 = vpack.c.bf16 %v845_v19, %v845_v19 }
  0xea   : > { %v813_v17 = vrot.slane %v812_v16, 1 }
  0xeb   : > { %v834_v28 = vrot.slane %v833_v15, 1  ;;  %v865_v36 = vunpack.c.l.b16 %v849_v31 }
  0xec   : > { %v814_v29 = vadd.f32 %v813_v17, %v812_v16 }
  0xed   : > { %v835_v30 = vadd.f32 %v834_v28, %v833_v15  ;;  %v1450_v15 = vld [vmem:[%s2129_s10 + $0x10] sm:$0xff] }
  0xee   : > { %v843_v9 = vmul.f32 %v842_v24, %v814_v29  ;;  %1107 = vmatpush.bf16.msrb.mxu2 %v1450_v15 }
  0xef   : > { %v846_v14 = vmul.f32 %v842_v24, %v835_v30 }
  0xf0   : > { %v847_v32 = vpack.c.bf16 %v843_v9, %v843_v9  ;;  %v1448_v9 = vld [vmem:[%s2129_s10] sm:$0xff] }
  0xf1   : > { %v850_v33 = vpack.c.bf16 %v846_v14, %v846_v14 }
  0xf2   : > { %v863_v34 = vunpack.c.l.b16 %v847_v32  ;;  %1108 = vmatpush.bf16.msrb.mxu2 %v1449_v27 }
  0xf3   : > { %v866_v37 = vunpack.c.l.b16 %v850_v33 }
  0xf4   : > { %1379 = vmatmul.msk.bf16.vlgmr.msrb.gmra.mxu3 %vm731_vm11, %v697_v57  ;;  %v868_v40 = vsel %vm867_vm10, %v864_v35, %v863_v34 }
  0xf5   : > { %v870_v41 = vsel %vm869_vm12, %v865_v36, %v868_v40 }
  0xf6   : > { %v872_v43 = vsel %vm871_vm13, %v866_v37, %v870_v41  ;;  %1109 = vmatpush.bf16.msrb.mxu2 %v1448_v9 }
  0xf7   : > { %v873_v44 = vpack.c.b16 %v872_v43, %v872_v43 }
  0xf9   : > { %1397 = vmatmul.msk.bf16.vlgmr.msrb.gmra.mxu0 %vm731_vm11, %v873_v44 }
 0x104   : > { %1380 = vmatmul.msk.bf16.gmra.mxu3 %vm731_vm11, %v698_v61 }
 0x155   : > { %v1985_v18 = vpop.f32.mrf.mxu1 }
 0x156   : > { %v1404_v22 = vmul.f32 -1.442695, %v1985_v18 }
 0x158   : > { %1522 = vpow2.f32 %v1404_v22 }
 0x15d   : > { %v1987_v21 = vpop.f32.mrf.mxu1 }
 0x15e   : > { %v1405_v23 = vmul.f32 -1.442695, %v1987_v21  ;;  %v1523_v52 = vpop.eup %1522 }
 0x15f   : > { %v990_v17 = vadd.f32 1.0, %v1523_v52 }
 0x160   : > { %1524 = vpow2.f32 %v1405_v23 }
 0x161   : > { %1526 = vrcp.f32 %v990_v17  ;;  %vm999_vm15 = vweird.f32 %v990_v17  ;;  %v1003_v44 = vand.u32 2147483647, %v990_v17 }
 0x163   : > { %vm1004_vm6 = vcmp.eq.f32.partialorder %v1003_v44, 8.507059e+37 }
 0x165   : > { %v1991_v24 = vpop.f32.mrf.mxu1 }
 0x166   : > { %v747_v10 = vpop.f32.mrf.mxu2  ;;  %v1525_v16 = vpop.eup %1524  ;;  %v1406_v29 = vmul.f32 -1.442695, %v1991_v24 }
 0x167   : > { %v752_v4 = vpop.f32.mrf.mxu3  ;;  %v991_v28 = vadd.f32 1.0, %v1525_v16  ;;  %v1527_v20 = vpop.eup %1526 }
 0x168   : > { %v995_v33 = vmul.f32 %v1527_v20, %v990_v17  ;;  %vm1000_vm1 = vweird.f32 %v1527_v20 }
 0x169   : > { %1528 = vrcp.f32 %v991_v28  ;;  %vm1014_vm2 = vweird.f32 %v991_v28  ;;  %vm2012_vm4 = vmor %vm999_vm15, %vm1000_vm1 }
 0x16a   : > { %1530 = vpow2.f32 %v1406_v29  ;;  %v996_v37 = vsub.f32 1.0, %v995_v33 }
 0x16c   : > { %v997_v41 = vmul.f32 %v1527_v20, %v996_v37 }
 0x16d   : > { %v1999_v19 = vpop.f32.mrf.mxu1 }
 0x16e   : > { %v749_v50 = vpop.f32.mrf.mxu2  ;;  %v1407_v30 = vmul.f32 -1.442695, %v1999_v19 }
 0x16f   : > { %v754_v45 = vpop.f32.mrf.mxu3  ;;  %v1529_v14 = vpop.eup %1528 }
 0x170   : > { %1532 = vpow2.f32 %v1407_v30  ;;  %v1531_v31 = vpop.eup %1530  ;;  %v1010_v34 = vmul.f32 %v1529_v14, %v991_v28  ;;  %vm1015_vm3 = vweird.f32 %v1529_v14 }
 0x171   : > { %v2006_v35 = vadd.f32 1.0, %v1531_v31  ;;  %vm1016_vm5 = vmor %vm1014_vm2, %vm1015_vm3 }
 0x172   : > { %v1011_v40 = vsub.f32 1.0, %v1010_v34 }
 0x173   : > { %1534 = vrcp.f32 %v2006_v35  ;;  %vm1029_vm8 = vweird.f32 %v2006_v35  ;;  %v1035_v16 = vand.u32 2147483648, %v2006_v35 }
 0x174   : > { %v1012_v43 = vmul.f32 %v1529_v14, %v1011_v40 }
 0x176   : > { %v910_v46 = vpop.f32.mrf.mxu0  ;;  %v1533_v32 = vpop.eup %1532 }
 0x177   : > { %v798_v42 = vpop.f32.mrf.mxu3  ;;  %v915_v25 = vrot.slane %v910_v46, 1  ;;  %v918_v47 = vperm.slane %v910_v46, 0  ;;  %v916_v7 = vrot.slane %v910_v46, 2  ;;  %v917_v60 = vrot.slane %v910_v46, 3 }
 0x178   : > { %v2008_v36 = vadd.f32 1.0, %v1533_v32 }
 0x179   : > { %v919_v48 = vperm.slane %v915_v25, 0  ;;  %v926_v49 = vmul.f32 %v918_v47, %v747_v10  ;;  %v920_v62 = vperm.slane %v916_v7, 0  ;;  %v921_v39 = vperm.slane %v917_v60, 0  ;;  %v1535_v46 = vpop.eup %1534 }
 0x17a   : > { %1536 = vrcp.f32 %v2008_v36  ;;  %v1020_v10 = vand.u32 2147483648, %v991_v28  ;;  %v1013_v47 = vadd.f32 %v1529_v14, %v1012_v43  ;;  %vm1030_vm9 = vweird.f32 %v1535_v46 }
 0x17b   : > { %v927_v53 = vmul.f32 %v919_v48, %v749_v50  ;;  %v930_v57 = vmul.f32 %v926_v49, %v798_v42  ;;  %v928_v63 = vmul.f32 %v920_v62, %v752_v4  ;;  %v929_v0 = vmul.f32 %v921_v39, %v754_v45  ;;  %vm1031_vm13 = vmor %vm1029_vm8, %vm1030_vm9 }
 0x17c   : > { %v1005_v4 = vand.u32 2147483648, %v990_v17  ;;  %v1018_v45 = vand.u32 2147483647, %v991_v28  ;;  %v998_v42 = vadd.f32 %v1527_v20, %v997_v41  ;;  %vm1044_vm10 = vweird.f32 %v2008_v36 }
 0x17d   : > { %v1048_v17 = vand.u32 2147483647, %v2008_v36  ;;  %v1036_v28 = vor.u32 1.1754944e-38, %v1035_v16 }
 0x17e   : > { %v912_v54 = vpop.f32.mrf.mxu0  ;;  %v1006_v50 = vor.u32 1.1754944e-38, %v1005_v4  ;;  %vm1019_vm7 = vcmp.eq.f32.partialorder %v1018_v45, 8.507059e+37 }
 0x17f   : > { %v800_v56 = vpop.f32.mrf.mxu3  ;;  %v1002_v54 = vsel %vm2012_vm4, %v1527_v20, %v998_v42  ;;  %vm1049_vm1 = vcmp.eq.f32.partialorder %v1048_v17, 8.507059e+37 }
 0x180   : > { %v931_v58 = vmul.f32 %v927_v53, %v800_v56  ;;  %v1537_v48 = vpop.eup %1536  ;;  %v1021_v53 = vor.u32 1.1754944e-38, %v1020_v10  ;;  %v1017_v56 = vsel %vm1016_vm5, %v1529_v14, %v1013_v47  ;;  %v1007_v60 = vsel %vm1004_vm6, %v1006_v50, %v1002_v54 }
 0x181   : > { %vm1045_vm12 = vweird.f32 %v1537_v48  ;;  %v1613_v47 = vmov 32.0  }
 0x182   : > { %v934_v59 = vpack.c.bf16 %v931_v58, %v930_v57  ;;  %v1025_v57 = vmul.f32 %v1535_v46, %v2006_v35  ;;  %v1040_v58 = vmul.f32 %v1537_v48, %v2008_v36  ;;  %1538 = vrcp.f32 %v1613_v47 }
 0x184   : > { %1402 = vmatmul.msk.bf16.vlgmr.msrb.gmra.mxu1 %vm952_vm14, %v934_v59  ;;  %v1501_v59 = vld [vmem:[%s2128_s9] ss:$0 sm:$0xff]  ;;  %v1026_v38 = vsub.f32 1.0, %v1025_v57  ;;  %v1041_v62 = vsub.f32 1.0, %v1040_v58 }
 0x185   : > { %v942_v7 = vmul.f32 %v1501_v59, %v1945_v51  ;;  %v944_v20 = vmul.f32 %v1501_v59, %v1937_v26  ;;  %v945_v33 = vmul.f32 %v1501_v59, %v1949_v55 }
 0x186   : > { %v1042_v22 = vmul.f32 %v1537_v48, %v1041_v62 }
 0x187   : > { %v803_v61 = vpop.f32.mrf.mxu3 }
 0x188   : > { %v932_v8 = vmul.f32 %v928_v63, %v803_v61  ;;  %v1022_v61 = vsel %vm1019_vm7, %v1021_v53, %v1017_v56  ;;  %v943_v63 = vmul.f32 %v1501_v59, %v1918_v11  ;;  %v1050_v11 = vand.u32 2147483648, %v2008_v36 }
 0x18a   : > { %v1051_v29 = vor.u32 1.1754944e-38, %v1050_v11 }
 0x18f   : > { %v805_v1 = vpop.f32.mrf.mxu3 }
 0x190   : > { %v933_v12 = vmul.f32 %v929_v0, %v805_v1  ;;  %v1054_v1 = vmul.f32 %v1007_v60, %v1985_v18  ;;  %v1033_v18 = vand.u32 2147483647, %v2006_v35 }
 0x192   : > { %v935_v13 = vpack.c.bf16 %v933_v12, %v932_v8  ;;  %v1055_v8 = vmul.f32 %v1022_v61, %v1987_v21  ;;  %v1043_v21 = vadd.f32 %v1537_v48, %v1042_v22  ;;  %vm1034_vm15 = vcmp.eq.f32.partialorder %v1033_v18, 8.507059e+37 }
 0x194   : > { %1403 = vmatmul.msk.bf16.gmra.mxu1 %vm952_vm14, %v935_v13  ;;  %v1027_v13 = vmul.f32 %v1535_v46, %v1026_v38  ;;  %vm1046_vm14 = vmor %vm1044_vm10, %vm1045_vm12 }
 0x195   : > { %v1047_v9 = vsel %vm1046_vm14, %v1537_v48, %v1043_v21  ;;  %v1539_v48 = vpop.eup %1538 }
 0x196   : > { %v1028_v15 = vadd.f32 %v1535_v46, %v1027_v13  ;;  %v1052_v31 = vsel %vm1049_vm1, %v1051_v29, %v1047_v9 }
 0x197   : > { %v1057_v36 = vmul.f32 %v1052_v31, %v1999_v19 }
 0x198   : > { %v1032_v30 = vsel %vm1031_vm13, %v1535_v46, %v1028_v15 }
 0x199   : > { %v1037_v14 = vsel %vm1034_vm15, %v1036_v28, %v1032_v30 }
 0x19a   : > { %v1056_v35 = vmul.f32 %v1037_v14, %v1991_v24 }
 0x201   : > { %v968_v49 = vpop.f32.mrf.mxu1 }
 0x202   : > { %v969_v39 = vadd.f32 %v968_v49, %v942_v7  ;;  %v1134_v49 = vmul.f32 32.0, %v1539_v48 }
 0x204   : > { %v1058_v23 = vmul.f32 %v1054_v1, %v969_v39 }
 0x209   : > { %v970_v0 = vpop.f32.mrf.mxu1 }
 0x20a   : > { %v971_v12 = vadd.f32 %v970_v0, %v943_v63 }
 0x20c   : > { %v1059_v52 = vmul.f32 %v1055_v8, %v971_v12 }
 0x20e   : > { %v1062_v51 = vpack.c.bf16 %v1059_v52, %v1058_v23 }
 0x210   : > { %1424 = vmatmul.msk.bf16.vlgmr.msrb.gmra.mxu2 %vm731_vm11, %v1062_v51 }
 0x211   : > { %v973_v27 = vpop.f32.mrf.mxu1 }
 0x212   : > { %v974_v32 = vadd.f32 %v973_v27, %v944_v20 }
 0x214   : > { %v1060_v40 = vmul.f32 %v1056_v35, %v974_v32 }
 0x219   : > { %v975_v34 = vpop.f32.mrf.mxu1 }
 0x21a   : > { %v976_v37 = vadd.f32 %v975_v34, %v945_v33  ;;  %v1502_v33 = vld [vmem:[%s2130_s11] ss:$0 sm:$0xff] }
 0x21c   : > { %v1061_v41 = vmul.f32 %v1057_v36, %v976_v37  ;;  %v1503_v36 = vld [vmem:[%s2131_s12] ss:$0 sm:$0xff] }
 0x21e   : > { %v1063_v43 = vpack.c.bf16 %v1061_v41, %v1060_v40 }
 0x220   : > { %1425 = vmatmul.msk.bf16.gmra.mxu2 %vm731_vm11, %v1063_v43  ;;  %vm1138_vm11 = vweird.f32 %v1539_v48 }
 0x293   : > { %v1111_v44 = vpop.f32.mrf.mxu2 }
 0x294   : > { %v1112_v4 = vadd.f32 %v1111_v44, %v1744_v2 }
 0x296   : > { %v1121_v26 = vsel %vm465_vm0, %v1112_v4, 0.0 }
 0x297   : > { %1122 = vadd.xlane.f32.xlu0 %v1121_v26 }
 0x29b   : > { %v1113_v45 = vpop.f32.mrf.mxu2 }
 0x29c   : > { %v1114_v55 = vadd.f32 %v1113_v45, %v1746_v3  ;;  %v1135_v3 = vsub.f32 1.0, %v1134_v49 }
 0x29e   : > { %v1124_v10 = vsel %vm465_vm0, %v1114_v55, 0.0  ;;  %v1136_v50 = vmul.f32 %v1539_v48, %v1135_v3 }
 0x29f   : > { %1125 = vadd.xlane.f32.xlu0 %v1124_v10 }
 0x2a0   : > { %v1137_v53 = vadd.f32 %v1539_v48, %v1136_v50 }
 0x2a2   : > { %v1139_v54 = vsel %vm1138_vm11, %v1539_v48, %v1137_v53 }
 0x2a3   : > { %v1116_v24 = vpop.f32.mrf.mxu2 }
 0x2a4   : > { %v1117_v19 = vadd.f32 %v1116_v24, %v1754_v5 }
 0x2a6   : > { %v1127_v46 = vsel %vm465_vm0, %v1117_v19, 0.0 }
 0x2a7   : > { %1128 = vadd.xlane.f32.xlu1 %v1127_v46 }
 0x2ab   : > { %v1118_v42 = vpop.f32.mrf.mxu2 }
 0x2ac   : > { %v1119_v25 = vadd.f32 %v1118_v42, %v1756_v6 }
 0x2ae   : > { %v1130_v2 = vsel %vm465_vm0, %v1119_v25, 0.0 }
 0x2af   : > { %1131 = vadd.xlane.f32.xlu1 %v1130_v2 }
 0x30a   : > { %v1123_v56 = vpop.xlane.xlu0 %1122 }
 0x30b   : > { %v1140_v5 = vmul.f32 %v1139_v54, %v1123_v56 }
 0x30d   : > { %v1144_v57 = vsub.f32 %v1112_v4, %v1140_v5 }
 0x30f   : > { %v1148_v58 = vmul.f32 %v1144_v57, %v1144_v57 }
 0x311   : > { %v1152_v59 = vsel %vm465_vm0, %v1148_v58, 0.0 }
 0x312   : > { %1153 = vadd.xlane.f32.xlu2 %v1152_v59  ;;  %v1126_v6 = vpop.xlane.xlu0 %1125 }
 0x313   : > { %v1141_v7 = vmul.f32 %v1139_v54, %v1126_v6 }
 0x315   : > { %v2048_v60 = vsub.f32 %v1114_v55, %v1141_v7 }
 0x317   : > { %v1149_v61 = vmul.f32 %v2048_v60, %v2048_v60 }
 0x319   : > { %v1155_v38 = vsel %vm465_vm0, %v1149_v61, 0.0 }
 0x31a   : > { %1156 = vadd.xlane.f32.xlu2 %v1155_v38  ;;  %v1129_v62 = vpop.xlane.xlu1 %1128 }
 0x31b   : > { %v1142_v39 = vmul.f32 %v1139_v54, %v1129_v62 }
 0x31d   : > { %v2053_v63 = vsub.f32 %v1117_v19, %v1142_v39 }
 0x31f   : > { %v1150_v0 = vmul.f32 %v2053_v63, %v2053_v63 }
 0x321   : > { %v1158_v1 = vsel %vm465_vm0, %v1150_v0, 0.0 }
 0x322   : > { %1159 = vadd.xlane.f32.xlu0 %v1158_v1  ;;  %v1132_v8 = vpop.xlane.xlu1 %1131 }
 0x323   : > { %v1143_v12 = vmul.f32 %v1139_v54, %v1132_v8 }
 0x325   : > { %v2058_v13 = vsub.f32 %v1119_v25, %v1143_v12 }
 0x327   : > { %v1151_v22 = vmul.f32 %v2058_v13, %v2058_v13 }
 0x329   : > { %v1161_v23 = vsel %vm465_vm0, %v1151_v22, 0.0 }
 0x32a   : > { %1162 = vadd.xlane.f32.xlu1 %v1161_v23 }
 0x385   : > { %v1154_v52 = vpop.xlane.xlu2 %1153 }
 0x386   : > { %v1164_v51 = vmul.f32 %v1154_v52, %v1139_v54 }
 0x388   : > { %v1168_v16 = vadd.f32 1e-05, %v1164_v51 }
 0x38a   : > { %1540 = vrsqrt.f32 %v1168_v16  ;;  %vm1178_vm3 = vweird.f32 %v1168_v16 }
 0x38d   : > { %v1157_v11 = vpop.xlane.xlu2 %1156 }
 0x38e   : > { %v1165_v15 = vmul.f32 %v1157_v11, %v1139_v54 }
 0x390   : > { %v1541_v18 = vpop.eup %1540  ;;  %v1169_v21 = vadd.f32 1e-05, %v1165_v15 }
 0x391   : > { %v1173_v17 = vmul.f32 %v1541_v18, %v1168_v16  ;;  %vm1179_vm2 = vweird.f32 %v1541_v18 }
 0x392   : > { %1542 = vrsqrt.f32 %v1169_v21  ;;  %vm1180_vm4 = vmor %vm1178_vm3, %vm1179_vm2  ;;  %vm1188_vm6 = vweird.f32 %v1169_v21 }
 0x393   : > { %v1174_v27 = vmul.f32 %v1541_v18, %v1173_v17 }
 0x395   : > { %v1175_v28 = vmul.f32 0.5, %v1174_v27  ;;  %v1160_v29 = vpop.xlane.xlu0 %1159 }
 0x396   : > { %v1166_v30 = vmul.f32 %v1160_v29, %v1139_v54 }
 0x397   : > { %v1176_v9 = vsub.f32 1.5, %v1175_v28 }
 0x398   : > { %v1543_v20 = vpop.eup %1542  ;;  %v1170_v14 = vadd.f32 1e-05, %v1166_v30 }
 0x399   : > { %v1177_v31 = vmul.f32 %v1541_v18, %v1176_v9  ;;  %v1183_v32 = vmul.f32 %v1543_v20, %v1169_v21  ;;  %vm1189_vm5 = vweird.f32 %v1543_v20 }
 0x39a   : > { %1544 = vrsqrt.f32 %v1170_v14  ;;  %vm1190_vm7 = vmor %vm1188_vm6, %vm1189_vm5  ;;  %vm1198_vm9 = vweird.f32 %v1170_v14 }
 0x39b   : > { %v1181_v34 = vsel %vm1180_vm4, %v1541_v18, %v1177_v31  ;;  %v1184_v35 = vmul.f32 %v1543_v20, %v1183_v32 }
 0x39c   : > { %v1212_v37 = vmul.f32 %v1181_v34, %v1144_v57 }
 0x39d   : > { %v1185_v40 = vmul.f32 0.5, %v1184_v35  ;;  %v1163_v41 = vpop.xlane.xlu1 %1162 }
 0x39e   : > { %v1220_v43 = vmul.f32 %v1502_v33, %v1212_v37  ;;  %v1167_v44 = vmul.f32 %v1163_v41, %v1139_v54 }
 0x39f   : > { %v1186_v4 = vsub.f32 1.5, %v1185_v40 }
 0x3a0   : > { %v1545_v26 = vpop.eup %1544  ;;  %v1228_v45 = vadd.f32 %v1503_v36, %v1220_v43  ;;  %v1171_v55 = vadd.f32 1e-05, %v1167_v44 }
 0x3a1   : > { %v1187_v10 = vmul.f32 %v1543_v20, %v1186_v4  ;;  %v1193_v24 = vmul.f32 %v1545_v26, %v1170_v14  ;;  %vm1199_vm8 = vweird.f32 %v1545_v26 }
 0x3a2   : > { %1232 = vst.msk [vmem:[%s2072_s24] sm:$0xff] %vm465_vm0, %v1228_v45  ;;  %1546 = vrsqrt.f32 %v1171_v55  ;;  %vm1200_vm10 = vmor %vm1198_vm9, %vm1199_vm8  ;;  %vm1208_vm13 = vweird.f32 %v1171_v55 }
 0x3a3   : > { %v1191_v19 = vsel %vm1190_vm7, %v1543_v20, %v1187_v10  ;;  %v1194_v46 = vmul.f32 %v1545_v26, %v1193_v24 }
 0x3a4   : > { %v1213_v42 = vmul.f32 %v1191_v19, %v2048_v60 }
 0x3a5   : > { %v1195_v25 = vmul.f32 0.5, %v1194_v46 }
 0x3a6   : > { %v1221_v2 = vmul.f32 %v1502_v33, %v1213_v42 }
 0x3a7   : > { %v1196_v47 = vsub.f32 1.5, %v1195_v25 }
 0x3a8   : > { %v1547_v48 = vpop.eup %1546  ;;  %v1229_v49 = vadd.f32 %v1503_v36, %v1221_v2 }
 0x3a9   : > { %v1197_v3 = vmul.f32 %v1545_v26, %v1196_v47  ;;  %v1203_v50 = vmul.f32 %v1547_v48, %v1171_v55  ;;  %vm1209_vm12 = vweird.f32 %v1547_v48 }
 0x3aa   : > { %1233 = vst.msk [vmem:[%s2072_s24 + $0x8] sm:$0xff] %vm465_vm0, %v1229_v49  ;;  %vm1210_vm14 = vmor %vm1208_vm13, %vm1209_vm12 }
 0x3ab   : > { %v1201_v53 = vsel %vm1200_vm10, %v1545_v26, %v1197_v3  ;;  %v1204_v54 = vmul.f32 %v1547_v48, %v1203_v50 }
 0x3ac   : > { %v1214_v56 = vmul.f32 %v1201_v53, %v2053_v63 }
 0x3ad   : > { %v1205_v5 = vmul.f32 0.5, %v1204_v54 }
 0x3ae   : > { %v1222_v57 = vmul.f32 %v1502_v33, %v1214_v56 }
 0x3af   : > { %v1206_v58 = vsub.f32 1.5, %v1205_v5 }
 0x3b0   : > { %v1230_v59 = vadd.f32 %v1503_v36, %v1222_v57 }
 0x3b1   : > { %v1207_v6 = vmul.f32 %v1547_v48, %v1206_v58 }
 0x3b2   : > { %1234 = vst.msk [vmem:[%s2072_s24 + $0x10] sm:$0xff] %vm465_vm0, %v1230_v59 }
 0x3b3   : > { %v1211_v7 = vsel %vm1210_vm14, %v1547_v48, %v1207_v6 }
 0x3b4   : > { %v1215_v60 = vmul.f32 %v1211_v7, %v2058_v13 }
 0x3b6   : > { %v1223_v61 = vmul.f32 %v1502_v33, %v1215_v60 }
 0x3b8   : > { %v1231_v38 = vadd.f32 %v1503_v36, %v1223_v61 }
 0x3ba   : > { %1235 = vst.msk [vmem:[%s2072_s24 + $0x18] sm:$0xff] %vm465_vm0, %v1231_v38 }
 0x3bb   : > { %1575 = shalt.err (!%p1572_p3)
}
 0x3bc   : > { %s1614_s16 = smov 128   ;;  %s1615_s24 = smov 8  }
 0x3bd   : > { %1457 = dma.vmem_to_hbm [thread:$0]  (%p1724_p5), %s1250_s22, 512, %s1252_s29, %s1237_s23, %s1614_s16, %s1614_s16, %s1615_s24  }
 0x3be PF: > { %p1463_p4 = scmp.ge.s32.totalorder %s1610_s28, 2  ;;  %s1266_s15 = sand.u32 1, %s1598_s25  }
 0x3bf   : > { %s1267_s1 = scalar_lea.sflag [#allocation3], %s1266_s15 }
 0x3c0   : > { %p1460_p7 = pnand %p1463_p4, %p1728_p6 }
 0x3c2   : > { %p1461_p8 = pneg %p1460_p7 }
 0x3c4   : > { %1593 = dma.done.wait (%p1461_p8), %s1267_s1, 512  }
 0x3c5   : > { %1595 = vsyncadd (%p1461_p8), %s1267_s1, 4294966784  ;;  %s2142_s0 = sld [smem:[#allocation5_spill]]  ;;  %p23_p9 = scmp.ge.s32.totalorder %s1711_s14, 4  }
 0x3c6   : > { %s2143_s25 = smov %s1602_s26  ;;  %s2144_s26 = smov %s1606_s27 }
 0x3c7   : > { %s2146_s28 = smov %s1711_s14  ;;  %25 = sbr.rel (!%p23_p9) target bundleno = 6 (0x6), region = 107 }
 0x3cb   : > { %s2145_s27 = smov %s2142_s0 }
 0x3cc   :  { %1273 = vsyncpa [#allocation3], 1 }
 0x3cd   :  { %1275 = vsyncpa [#allocation3 + $0x1], 1 }

</bundles_post_ra>
